<compile_context>
chip_gen: v7x
topology: tpu7x:2x2x1
jax: 0.10.0
libtpu: 0.0.40
codegen_flags: <defaults>
</compile_context>

<pallas_src>
import jax
import jax.numpy as jnp
from jax.experimental import pallas as pl
from jax.experimental.pallas import tpu as pltpu


def _se_basic_block_kernel(x_ref, w1_ref, b1_ref, w2_ref, b2_ref,
                           fc1w_ref, fc1b_ref, fc2w_ref, fc2b_ref,
                           out_ref, pad_ref):
    # x_ref   : (NB, H, W*C)        input block, f32, lane-dense (W*C on lanes)
    # w*_ref  : (3*W*C, W*C)        banded conv weights (BN scale folded), bf16
    # b*_ref  : (1, W*C)            folded BN bias tiled over W, f32
    # fc1w_ref: (W*C, hidden)       SE fc1, pre-tiled over W and pre-scaled by 1/(H*W)
    # fc2w_ref: (hidden, W*C)       SE fc2, pre-tiled over W (gate comes out lane-dense)
    # out_ref : (NB, H, W*C)
    # pad_ref : (NB, H+2, W*C)      VMEM scratch: activation with a 1-row H halo
    NB, H, WC = out_ref.shape
    M = NB * H

    # Zero only the two H-halo rows per image (lane-dense, tiny). Re-zeroed every grid
    # step so the kernel stays correct when the "parallel" axis is megacore-sharded
    # (a core whose first step has program_id != 0 still gets a clean halo).
    zrow = jnp.zeros((NB, 1, WC), jnp.float32)
    pad_ref[:, 0:1, :] = zrow
    pad_ref[:, H + 1:H + 2, :] = zrow

    def conv_im2col(w_ref):
        # Three H-shifted, lane-dense views of the halo'd activation; concatenation is
        # along the lane dim at 128-aligned offsets, then one MXU matmul with K = 3*W*C.
        up = pad_ref[:, 0:H, :]
        mid = pad_ref[:, 1:H + 1, :]
        down = pad_ref[:, 2:H + 2, :]
        patch = jnp.concatenate([up, mid, down], axis=2)          # (NB, H, 3*WC) f32
        patch = patch.reshape(M, 3 * WC).astype(jnp.bfloat16)
        return jnp.dot(patch, w_ref[...],
                       preferred_element_type=jnp.float32)        # (M, WC) f32

    # ---- conv1 (3x3, stride 1, pad 1) + folded bn1 + relu ----
    pad_ref[:, 1:H + 1, :] = x_ref[...]
    h1 = jnp.maximum(conv_im2col(w1_ref) + b1_ref[...], 0.0)      # (M, WC)

    # ---- conv2 + folded bn2 (scratch halo rows are still zero) ----
    pad_ref[:, 1:H + 1, :] = h1.reshape(NB, H, WC)
    out2 = conv_im2col(w2_ref) + b2_ref[...]                      # (M, WC)

    # Residual is re-read from VMEM here (keeps x's live range out of the conv loops).
    residual = x_ref[...].reshape(M, WC)                          # downsample=None path
    out_plus = out2 + residual

    # ---- SE: global average pool of (out2 * residual) over (H, W), per channel ----
    prod = out2 * residual
    row_sums = jnp.sum(prod.reshape(NB, H, WC), axis=1)           # (NB, WC)
    # fc1 is pre-tiled over W and pre-scaled by 1/(H*W), so row_sums @ fc1w == pool @ fc1.
    hid = jnp.maximum(
        jnp.dot(row_sums, fc1w_ref[...], preferred_element_type=jnp.float32)
        + fc1b_ref[...], 0.0)                                     # (NB, hidden)
    # fc2 is pre-tiled over W, so the gate is already laid out as (NB, W*C).
    se = jax.nn.sigmoid(
        jnp.dot(hid, fc2w_ref[...], preferred_element_type=jnp.float32)
        + fc2b_ref[...]) + 0.5                                    # (NB, WC)

    # ---- channel-wise rescale + final relu, one lane-dense full-block store ----
    out_ref[...] = jnp.maximum(out_plus.reshape(NB, H, WC) * se[:, None, :], 0.0)


def _banded_conv_weight(w_hwio, W):
    """(3, 3, Cin, Cout) HWIO conv weight -> banded (3*W*Cin, W*Cout) matmul weight.

    Row index  kh*(W*Cin) + w_i*Cin + c_i  multiplies patch element x[h+kh-1, w_i, c_i];
    col index  w_o*Cout + c_o  produces out[h, w_o, c_o].  The band structure encodes the
    kw taps and the zero padding along W."""
    KH, KW, Cin, Cout = w_hwio.shape
    big = jnp.zeros((KH, W, Cin, W, Cout), w_hwio.dtype)
    for kw in range(KW):
        for wo in range(W):
            wi = wo + kw - 1
            if 0 <= wi < W:
                big = big.at[:, wi, :, wo, :].set(w_hwio[:, kw])
    return big.reshape(KH * W * Cin, W * Cout)


def se_basic_block(x_nchw, params, batch_block=None):
    """x_nchw: (N, C, H, W) float32 -> (N, C, H, W) float32."""
    x_nhwc = jnp.transpose(x_nchw, (0, 2, 3, 1))                  # NCHW -> NHWC
    N, H, W, C = x_nhwc.shape
    WC = W * C
    x = x_nhwc.reshape(N, H, WC)                                  # lane-dense layout
    hidden = params["fc1w"].shape[1]

    # Fold inference-mode BN scale into the conv weights (output-channel axis of HWIO),
    # build the banded matmul weights, cast to bf16 for the MXU.
    w1f = params["w1"] * params["s1"].reshape(1, 1, 1, C)
    w2f = params["w2"] * params["s2"].reshape(1, 1, 1, C)
    w1b = _banded_conv_weight(w1f, W).astype(jnp.bfloat16)        # (3*WC, WC)
    w2b = _banded_conv_weight(w2f, W).astype(jnp.bfloat16)
    b1 = jnp.tile(params["b1"].reshape(1, C), (1, W))             # (1, WC)
    b2 = jnp.tile(params["b2"].reshape(1, C), (1, W))
    fc1w = jnp.tile(params["fc1w"], (W, 1)) / float(H * W)        # (WC, hidden)
    fc1b = params["fc1b"].reshape(1, hidden)
    fc2w = jnp.tile(params["fc2w"], (1, W))                       # (hidden, WC)
    fc2b = jnp.tile(params["fc2b"].reshape(1, C), (1, W))         # (1, WC)

    if batch_block is None:
        # >= 4 grid steps when the batch allows it (pipelining + both v7x TensorCores
        # still double-buffer); otherwise one image per step.
        nb = max(1, N // 4) if N % 4 == 0 else 1
    else:
        nb = batch_block
    assert N % nb == 0, "batch_block must divide N"
    grid = (N // nb,)

    # Explicit VMEM budget (capped at v7x's 64 MiB; default scoped limit is only 32 MiB):
    # double-buffered in/out blocks + weights + scratch + live temporaries (patches, h1,
    # out2, ...), with generous headroom.
    blk_bytes = nb * H * WC * 4
    w_bytes = (w1b.size + w2b.size) * 2 + (b1.size + b2.size + fc1w.size
                                           + fc1b.size + fc2w.size + fc2b.size) * 4
    scratch_bytes = nb * (H + 2) * WC * 4
    vmem_limit = int(min(64 * 2**20,
                         max(16 * 2**20,
                             4 * blk_bytes + 2 * w_bytes + scratch_bytes
                             + 10 * blk_bytes)))

    out = pl.pallas_call(
        _se_basic_block_kernel,
        out_shape=jax.ShapeDtypeStruct((N, H, WC), jnp.float32),
        grid_spec=pltpu.PrefetchScalarGridSpec(
            num_scalar_prefetch=0,
            grid=grid,
            in_specs=[
                pl.BlockSpec((nb, H, WC), lambda n: (n, 0, 0)),   # x (lane-dense)
                pl.BlockSpec((3 * WC, WC), lambda n: (0, 0)),     # w1 banded, bf16
                pl.BlockSpec((1, WC), lambda n: (0, 0)),          # b1 tiled
                pl.BlockSpec((3 * WC, WC), lambda n: (0, 0)),     # w2 banded, bf16
                pl.BlockSpec((1, WC), lambda n: (0, 0)),          # b2 tiled
                pl.BlockSpec((WC, hidden), lambda n: (0, 0)),     # fc1w tiled / (H*W)
                pl.BlockSpec((1, hidden), lambda n: (0, 0)),      # fc1b
                pl.BlockSpec((hidden, WC), lambda n: (0, 0)),     # fc2w tiled
                pl.BlockSpec((1, WC), lambda n: (0, 0)),          # fc2b tiled
            ],
            out_specs=pl.BlockSpec((nb, H, WC), lambda n: (n, 0, 0)),
            scratch_shapes=[pltpu.VMEM((nb, H + 2, WC), jnp.float32)],
        ),
        compiler_params=pltpu.CompilerParams(
            dimension_semantics=("parallel",),
            vmem_limit_bytes=vmem_limit),
    )(x, w1b, b1, w2b, b2, fc1w, fc1b, fc2w, fc2b)

    return jnp.transpose(out.reshape(N, H, W, C), (0, 3, 1, 2))   # NHWC -> NCHW


def init_params(key, inplanes=16, planes=16):
    assert inplanes == planes, "downsample=None path requires inplanes == planes"
    hidden = max(planes // 16, 1)
    eps = 1e-5
    ks = jax.random.split(key, 16)

    w1 = jax.random.normal(ks[0], (3, 3, inplanes, planes), jnp.float32) * 0.1
    w2 = jax.random.normal(ks[1], (3, 3, planes, planes), jnp.float32) * 0.1

    def folded_bn(kg, kb, km, kv):
        gamma = 1.0 + 0.1 * jax.random.normal(kg, (planes,), jnp.float32)
        beta = 0.1 * jax.random.normal(kb, (planes,), jnp.float32)
        mean = 0.1 * jax.random.normal(km, (planes,), jnp.float32)
        var = 1.0 + 0.5 * jax.random.uniform(kv, (planes,), jnp.float32)
        scale = gamma / jnp.sqrt(var + eps)
        bias = beta - mean * scale
        return scale.reshape(1, planes), bias.reshape(1, planes)

    s1, b1 = folded_bn(ks[2], ks[3], ks[4], ks[5])
    s2, b2 = folded_bn(ks[6], ks[7], ks[8], ks[9])

    fc1w = jax.random.normal(ks[10], (planes, hidden), jnp.float32) * 0.3
    fc1b = (0.1 * jax.random.normal(ks[11], (hidden,), jnp.float32)).reshape(1, hidden)
    fc2w = jax.random.normal(ks[12], (hidden, planes), jnp.float32) * 0.3
    fc2b = (0.1 * jax.random.normal(ks[13], (planes,), jnp.float32)).reshape(1, planes)

    return dict(w1=w1, s1=s1, b1=b1, w2=w2, s2=s2, b2=b2,
                fc1w=fc1w, fc1b=fc1b, fc2w=fc2w, fc2b=fc2b)


def _reference_forward(x_nchw, p):
    """Pure-JAX f32 reference of SEBasicBlock.forward (inference-mode BN)."""
    x = jnp.transpose(x_nchw, (0, 2, 3, 1))                       # NHWC
    conv = lambda z, w: jax.lax.conv_general_dilated(
        z, w, (1, 1), "SAME", dimension_numbers=("NHWC", "HWIO", "NHWC"))
    out = jnp.maximum(conv(x, p["w1"]) * p["s1"] + p["b1"], 0.0)
    out = conv(out, p["w2"]) * p["s2"] + p["b2"]
    residual = x
    out_final = out + residual
    se = jnp.mean(out * residual, axis=(1, 2))                    # (N, C)
    se = jnp.maximum(se @ p["fc1w"] + p["fc1b"], 0.0)
    se = jax.nn.sigmoid(se @ p["fc2w"] + p["fc2b"]) + 0.5
    out_final = jnp.maximum(out_final * se[:, None, None, :], 0.0)
    return jnp.transpose(out_final, (0, 3, 1, 2))                 # NCHW


if __name__ == "__main__":
    key = jax.random.PRNGKey(0)
    kx, kp = jax.random.split(key)

    # planes must be >= 16 so planes // 16 >= 1 (fc1 output dim), matching the module.
    # W*C = 8*16 = 128 -> exactly one full lane tile on the minor dim.
    N, C, H, W = 2, 16, 8, 8
    x = jax.random.normal(kx, (N, C, H, W), jnp.float32)
    params = init_params(kp, inplanes=C, planes=C)

    out = jax.block_until_ready(se_basic_block(x, params))
    ref = _reference_forward(x, params)

    assert out.shape == (N, C, H, W), out.shape
    # The kernel feeds bf16 operands to the MXU (f32 accumulate); typical deviation from
    # the pure-f32 reference is ~1e-2 at these magnitudes, so use a bf16-appropriate tol.
    max_err = float(jnp.max(jnp.abs(out - ref)))
    assert bool(jnp.allclose(out, ref, atol=1e-1, rtol=1e-1)), max_err
    print("KERNEL_OK")
</pallas_src>

<mosaic_0001>
module attributes {stable_mosaic.version = 11 : i64} {
  func.func @_se_basic_block_kernel(%arg0: i32, %arg1: memref<1x8x128xf32, #tpu.memory_space<vmem>>, %arg2: memref<384x128xbf16, #tpu.memory_space<vmem>>, %arg3: memref<1x128xf32, #tpu.memory_space<vmem>>, %arg4: memref<384x128xbf16, #tpu.memory_space<vmem>>, %arg5: memref<1x128xf32, #tpu.memory_space<vmem>>, %arg6: memref<128x1xf32, #tpu.memory_space<vmem>>, %arg7: memref<1x1xf32, #tpu.memory_space<vmem>>, %arg8: memref<1x128xf32, #tpu.memory_space<vmem>>, %arg9: memref<1x128xf32, #tpu.memory_space<vmem>>, %arg10: memref<1x8x128xf32, #tpu.memory_space<vmem>>, %arg11: memref<1x10x128xf32, #tpu.memory_space<vmem>>) attributes {dimension_semantics = [#tpu.dimension_semantics<parallel>], iteration_bounds = array<i64: 2>, scalar_prefetch = 0 : i64, scratch_operands = 1 : i64, tpu.core_type = #tpu.core_type<tc>, window_params = [{transform_indices = @transform_0, window_bounds = array<i64: 1, 8, 128>}, {pipeline_mode = #tpu.pipeline_mode<synchronous>, transform_indices = @transform_1, window_bounds = array<i64: 384, 128>}, {pipeline_mode = #tpu.pipeline_mode<synchronous>, transform_indices = @transform_2, window_bounds = array<i64: 1, 128>}, {pipeline_mode = #tpu.pipeline_mode<synchronous>, transform_indices = @transform_3, window_bounds = array<i64: 384, 128>}, {pipeline_mode = #tpu.pipeline_mode<synchronous>, transform_indices = @transform_4, window_bounds = array<i64: 1, 128>}, {pipeline_mode = #tpu.pipeline_mode<synchronous>, transform_indices = @transform_5, window_bounds = array<i64: 128, 1>}, {pipeline_mode = #tpu.pipeline_mode<synchronous>, transform_indices = @transform_6, window_bounds = array<i64: 1, 1>}, {pipeline_mode = #tpu.pipeline_mode<synchronous>, transform_indices = @transform_7, window_bounds = array<i64: 1, 128>}, {pipeline_mode = #tpu.pipeline_mode<synchronous>, transform_indices = @transform_8, window_bounds = array<i64: 1, 128>}, {transform_indices = @transform_9, window_bounds = array<i64: 1, 8, 128>}]} {
    %cst = arith.constant 0.000000e+00 : f32
    %0 = vector.broadcast %cst : f32 to vector<1x1x128xf32>
    %c0 = arith.constant 0 : index
    %c0_0 = arith.constant 0 : index
    %c0_1 = arith.constant 0 : index
    %1 = vector.load %arg11[%c0, %c0_0, %c0_1] : memref<1x10x128xf32, #tpu.memory_space<vmem>>, vector<1x1x128xf32>
    tpu.vector_store %arg11[%c0, %c0_0, %c0_1], %0 {strides = array<i32>} : memref<1x10x128xf32, #tpu.memory_space<vmem>>, vector<1x1x128xf32>,
    %c0_2 = arith.constant 0 : index
    %c9 = arith.constant 9 : index
    %c0_3 = arith.constant 0 : index
    %2 = vector.load %arg11[%c0_2, %c9, %c0_3] : memref<1x10x128xf32, #tpu.memory_space<vmem>>, vector<1x1x128xf32>
    tpu.vector_store %arg11[%c0_2, %c9, %c0_3], %0 {strides = array<i32>} : memref<1x10x128xf32, #tpu.memory_space<vmem>>, vector<1x1x128xf32>,
    %c0_4 = arith.constant 0 : index
    %c0_5 = arith.constant 0 : index
    %c0_6 = arith.constant 0 : index
    %3 = vector.load %arg1[%c0_4, %c0_5, %c0_6] : memref<1x8x128xf32, #tpu.memory_space<vmem>>, vector<1x8x128xf32>
    %c0_7 = arith.constant 0 : index
    %c1 = arith.constant 1 : index
    %c0_8 = arith.constant 0 : index
    %4 = vector.load %arg11[%c0_7, %c1, %c0_8] : memref<1x10x128xf32, #tpu.memory_space<vmem>>, vector<1x8x128xf32>
    tpu.vector_store %arg11[%c0_7, %c1, %c0_8], %3 {strides = array<i32>} : memref<1x10x128xf32, #tpu.memory_space<vmem>>, vector<1x8x128xf32>,
    %c0_9 = arith.constant 0 : index
    %c0_10 = arith.constant 0 : index
    %c0_11 = arith.constant 0 : index
    %5 = vector.load %arg11[%c0_9, %c0_10, %c0_11] : memref<1x10x128xf32, #tpu.memory_space<vmem>>, vector<1x8x128xf32>
    %c0_12 = arith.constant 0 : index
    %c1_13 = arith.constant 1 : index
    %c0_14 = arith.constant 0 : index
    %6 = vector.load %arg11[%c0_12, %c1_13, %c0_14] : memref<1x10x128xf32, #tpu.memory_space<vmem>>, vector<1x8x128xf32>
    %c0_15 = arith.constant 0 : index
    %c2 = arith.constant 2 : index
    %c0_16 = arith.constant 0 : index
    %7 = vector.load %arg11[%c0_15, %c2, %c0_16] : memref<1x10x128xf32, #tpu.memory_space<vmem>>, vector<1x8x128xf32>
    %8 = tpu.concatenate %5, %6, %7 in 2 : vector<1x8x128xf32>, vector<1x8x128xf32>, vector<1x8x128xf32> -> vector<1x8x384xf32>
    %9 = vector.shape_cast %8 : vector<1x8x384xf32> to vector<8x384xf32>
    %10 = arith.truncf %9 : vector<8x384xf32> to vector<8x384xbf16>
    %c0_17 = arith.constant 0 : index
    %c0_18 = arith.constant 0 : index
    %11 = vector.load %arg2[%c0_17, %c0_18] : memref<384x128xbf16, #tpu.memory_space<vmem>>, vector<384x128xbf16>
    %cst_19 = arith.constant dense<0.000000e+00> : vector<8x128xf32>
    %12 = tpu.matmul %10, %11, %cst_19 {dimension_numbers = #tpu.dot_dimension_numbers<[1], [0], [0], [1], [0, 0, 1, 1], [], []>} : vector<8x384xbf16>, vector<384x128xbf16>, vector<8x128xf32> -> vector<8x128xf32>
    %c0_20 = arith.constant 0 : index
    %c0_21 = arith.constant 0 : index
    %13 = vector.load %arg3[%c0_20, %c0_21] : memref<1x128xf32, #tpu.memory_space<vmem>>, vector<1x128xf32>
    %14 = vector.broadcast %13 : vector<1x128xf32> to vector<8x128xf32>
    %15 = arith.addf %12, %14 : vector<8x128xf32>
    %cst_22 = arith.constant 0.000000e+00 : f32
    %16 = vector.broadcast %cst_22 : f32 to vector<8x128xf32>
    %17 = arith.maximumf %15, %16 : vector<8x128xf32>
    %18 = vector.shape_cast %17 : vector<8x128xf32> to vector<1x8x128xf32>
    %c0_23 = arith.constant 0 : index
    %c1_24 = arith.constant 1 : index
    %c0_25 = arith.constant 0 : index
    %19 = vector.load %arg11[%c0_23, %c1_24, %c0_25] : memref<1x10x128xf32, #tpu.memory_space<vmem>>, vector<1x8x128xf32>
    tpu.vector_store %arg11[%c0_23, %c1_24, %c0_25], %18 {strides = array<i32>} : memref<1x10x128xf32, #tpu.memory_space<vmem>>, vector<1x8x128xf32>,
    %c0_26 = arith.constant 0 : index
    %c0_27 = arith.constant 0 : index
    %c0_28 = arith.constant 0 : index
    %20 = vector.load %arg11[%c0_26, %c0_27, %c0_28] : memref<1x10x128xf32, #tpu.memory_space<vmem>>, vector<1x8x128xf32>
    %c0_29 = arith.constant 0 : index
    %c1_30 = arith.constant 1 : index
    %c0_31 = arith.constant 0 : index
    %21 = vector.load %arg11[%c0_29, %c1_30, %c0_31] : memref<1x10x128xf32, #tpu.memory_space<vmem>>, vector<1x8x128xf32>
    %c0_32 = arith.constant 0 : index
    %c2_33 = arith.constant 2 : index
    %c0_34 = arith.constant 0 : index
    %22 = vector.load %arg11[%c0_32, %c2_33, %c0_34] : memref<1x10x128xf32, #tpu.memory_space<vmem>>, vector<1x8x128xf32>
    %23 = tpu.concatenate %20, %21, %22 in 2 : vector<1x8x128xf32>, vector<1x8x128xf32>, vector<1x8x128xf32> -> vector<1x8x384xf32>
    %24 = vector.shape_cast %23 : vector<1x8x384xf32> to vector<8x384xf32>
    %25 = arith.truncf %24 : vector<8x384xf32> to vector<8x384xbf16>
    %c0_35 = arith.constant 0 : index
    %c0_36 = arith.constant 0 : index
    %26 = vector.load %arg4[%c0_35, %c0_36] : memref<384x128xbf16, #tpu.memory_space<vmem>>, vector<384x128xbf16>
    %cst_37 = arith.constant dense<0.000000e+00> : vector<8x128xf32>
    %27 = tpu.matmul %25, %26, %cst_37 {dimension_numbers = #tpu.dot_dimension_numbers<[1], [0], [0], [1], [0, 0, 1, 1], [], []>} : vector<8x384xbf16>, vector<384x128xbf16>, vector<8x128xf32> -> vector<8x128xf32>
    %c0_38 = arith.constant 0 : index
    %c0_39 = arith.constant 0 : index
    %28 = vector.load %arg5[%c0_38, %c0_39] : memref<1x128xf32, #tpu.memory_space<vmem>>, vector<1x128xf32>
    %29 = vector.broadcast %28 : vector<1x128xf32> to vector<8x128xf32>
    %30 = arith.addf %27, %29 : vector<8x128xf32>
    %c0_40 = arith.constant 0 : index
    %c0_41 = arith.constant 0 : index
    %c0_42 = arith.constant 0 : index
    %31 = vector.load %arg1[%c0_40, %c0_41, %c0_42] : memref<1x8x128xf32, #tpu.memory_space<vmem>>, vector<1x8x128xf32>
    %32 = vector.shape_cast %31 : vector<1x8x128xf32> to vector<8x128xf32>
    %33 = arith.addf %30, %32 : vector<8x128xf32>
    %34 = arith.mulf %30, %32 : vector<8x128xf32>
    %35 = vector.shape_cast %34 : vector<8x128xf32> to vector<1x8x128xf32>
    %cst_43 = arith.constant dense<0.000000e+00> : vector<1x128xf32>
    %36 = vector.multi_reduction <add>, %35, %cst_43 [1] : vector<1x8x128xf32> to vector<1x128xf32>
    %c0_44 = arith.constant 0 : index
    %c0_45 = arith.constant 0 : index
    %37 = vector.load %arg6[%c0_44, %c0_45] : memref<128x1xf32, #tpu.memory_space<vmem>>, vector<128x1xf32>
    %cst_46 = arith.constant dense<0.000000e+00> : vector<1x1xf32>
    %38 = tpu.matmul %36, %37, %cst_46 {dimension_numbers = #tpu.dot_dimension_numbers<[1], [0], [0], [1], [0, 0, 1, 1], [], []>} : vector<1x128xf32>, vector<128x1xf32>, vector<1x1xf32> -> vector<1x1xf32>
    %c0_47 = arith.constant 0 : index
    %c0_48 = arith.constant 0 : index
    %39 = vector.load %arg7[%c0_47, %c0_48] : memref<1x1xf32, #tpu.memory_space<vmem>>, vector<1x1xf32>
    %40 = arith.addf %38, %39 : vector<1x1xf32>
    %cst_49 = arith.constant 0.000000e+00 : f32
    %41 = vector.broadcast %cst_49 : f32 to vector<1x1xf32>
    %42 = arith.maximumf %40, %41 : vector<1x1xf32>
    %c0_50 = arith.constant 0 : index
    %c0_51 = arith.constant 0 : index
    %43 = vector.load %arg8[%c0_50, %c0_51] : memref<1x128xf32, #tpu.memory_space<vmem>>, vector<1x128xf32>
    %cst_52 = arith.constant dense<0.000000e+00> : vector<1x128xf32>
    %44 = tpu.matmul %42, %43, %cst_52 {dimension_numbers = #tpu.dot_dimension_numbers<[1], [0], [0], [1], [0, 0, 1, 1], [], []>} : vector<1x1xf32>, vector<1x128xf32>, vector<1x128xf32> -> vector<1x128xf32>
    %c0_53 = arith.constant 0 : index
    %c0_54 = arith.constant 0 : index
    %45 = vector.load %arg9[%c0_53, %c0_54] : memref<1x128xf32, #tpu.memory_space<vmem>>, vector<1x128xf32>
    %46 = arith.addf %44, %45 : vector<1x128xf32>
    %47 = arith.negf %46 : vector<1x128xf32>
    %48 = math.exp %47 : vector<1x128xf32>
    %cst_55 = arith.constant 1.000000e+00 : f32
    %49 = vector.broadcast %cst_55 : f32 to vector<1x128xf32>
    %50 = arith.addf %49, %48 : vector<1x128xf32>
    %51 = arith.divf %49, %50 : vector<1x128xf32>
    %cst_56 = arith.constant 5.000000e-01 : f32
    %52 = vector.broadcast %cst_56 : f32 to vector<1x128xf32>
    %53 = arith.addf %51, %52 : vector<1x128xf32>
    %54 = vector.shape_cast %33 : vector<8x128xf32> to vector<1x8x128xf32>
    %55 = vector.shape_cast %53 : vector<1x128xf32> to vector<1x1x128xf32>
    %56 = vector.broadcast %55 : vector<1x1x128xf32> to vector<1x8x128xf32>
    %57 = arith.mulf %54, %56 : vector<1x8x128xf32>
    %cst_57 = arith.constant 0.000000e+00 : f32
    %58 = vector.broadcast %cst_57 : f32 to vector<1x8x128xf32>
    %59 = arith.maximumf %57, %58 : vector<1x8x128xf32>
    %c0_58 = arith.constant 0 : index
    %c0_59 = arith.constant 0 : index
    %c0_60 = arith.constant 0 : index
    %60 = vector.load %arg10[%c0_58, %c0_59, %c0_60] : memref<1x8x128xf32, #tpu.memory_space<vmem>>, vector<1x8x128xf32>
    tpu.vector_store %arg10[%c0_58, %c0_59, %c0_60], %59 {strides = array<i32>} : memref<1x8x128xf32, #tpu.memory_space<vmem>>, vector<1x8x128xf32>,
    return
  }
  func.func @transform_0(%arg0: i32) -> (i32, i32, i32) {
    %c0_i32 = arith.constant 0 : i32
    %c0_i32_0 = arith.constant 0 : i32
    %c0_i32_1 = arith.constant 0 : i32
    return %arg0, %c0_i32, %c0_i32_0 : i32, i32, i32
  }
  func.func @transform_1(%arg0: i32) -> (i32, i32) {
    %c0_i32 = arith.constant 0 : i32
    %c0_i32_0 = arith.constant 0 : i32
    %c0_i32_1 = arith.constant 0 : i32
    return %c0_i32, %c0_i32_0 : i32, i32
  }
  func.func @transform_2(%arg0: i32) -> (i32, i32) {
    %c0_i32 = arith.constant 0 : i32
    %c0_i32_0 = arith.constant 0 : i32
    %c0_i32_1 = arith.constant 0 : i32
    return %c0_i32, %c0_i32_0 : i32, i32
  }
  func.func @transform_3(%arg0: i32) -> (i32, i32) {
    %c0_i32 = arith.constant 0 : i32
    %c0_i32_0 = arith.constant 0 : i32
    %c0_i32_1 = arith.constant 0 : i32
    return %c0_i32, %c0_i32_0 : i32, i32
  }
  func.func @transform_4(%arg0: i32) -> (i32, i32) {
    %c0_i32 = arith.constant 0 : i32
    %c0_i32_0 = arith.constant 0 : i32
    %c0_i32_1 = arith.constant 0 : i32
    return %c0_i32, %c0_i32_0 : i32, i32
  }
  func.func @transform_5(%arg0: i32) -> (i32, i32) {
    %c0_i32 = arith.constant 0 : i32
    %c0_i32_0 = arith.constant 0 : i32
    %c0_i32_1 = arith.constant 0 : i32
    return %c0_i32, %c0_i32_0 : i32, i32
  }
  func.func @transform_6(%arg0: i32) -> (i32, i32) {
    %c0_i32 = arith.constant 0 : i32
    %c0_i32_0 = arith.constant 0 : i32
    %c0_i32_1 = arith.constant 0 : i32
    return %c0_i32, %c0_i32_0 : i32, i32
  }
  func.func @transform_7(%arg0: i32) -> (i32, i32) {
    %c0_i32 = arith.constant 0 : i32
    %c0_i32_0 = arith.constant 0 : i32
    %c0_i32_1 = arith.constant 0 : i32
    return %c0_i32, %c0_i32_0 : i32, i32
  }
  func.func @transform_8(%arg0: i32) -> (i32, i32) {
    %c0_i32 = arith.constant 0 : i32
    %c0_i32_0 = arith.constant 0 : i32
    %c0_i32_1 = arith.constant 0 : i32
    return %c0_i32, %c0_i32_0 : i32, i32
  }
  func.func @transform_9(%arg0: i32) -> (i32, i32, i32) {
    %c0_i32 = arith.constant 0 : i32
    %c0_i32_0 = arith.constant 0 : i32
    %c0_i32_1 = arith.constant 0 : i32
    return %arg0, %c0_i32, %c0_i32_0 : i32, i32, i32
  }
}

</mosaic_0001>

<bundles_post_ra>
// kernel: tpu_custom_call.1
= control target key start
LH: loop header
LB: loop body
LE: loop exit
PB: predicated region body
PF: predicated region fallthrough
CT: control target
= control target key end

     0   :  { %s2055_s0 = inlined_call_operand.vmem [shape: f32[2,8,128], index: 0, kind: input, shape index: {}]   ;;  %s2056_s1 = inlined_call_operand.hbm [shape: bf16[384,128], index: 1, kind: input, shape index: {}]   ;;  %s2057_s2 = inlined_call_operand.vmem [shape: f32[1,128], index: 2, kind: input, shape index: {}]   ;;  %s2058_s3 = inlined_call_operand.hbm [shape: bf16[384,128], index: 3, kind: input, shape index: {}]   ;;  %s2059_s4 = inlined_call_operand.vmem [shape: f32[1,128], index: 4, kind: input, shape index: {}]   ;;  %s2060_s5 = inlined_call_operand.vmem [shape: f32[128,1], index: 5, kind: input, shape index: {}]   ;;  %s2061_s6 = inlined_call_operand.<no memory space> [shape: f32[1,1], index: 6, kind: input, shape index: {}]   ;;  %s2062_s7 = inlined_call_operand.vmem [shape: f32[1,128], index: 7, kind: input, shape index: {}]   ;;  %s2063_s8 = inlined_call_operand.vmem [shape: f32[1,128], index: 8, kind: input, shape index: {}]   ;;  %s2064_s9 = inlined_call_operand.hbm [shape: f32[2,8,128], index: 9, kind: output, shape index: {}]  }
   0x1   :  { %v14_v0 = vstv %s2061_s6 }
   0x2   :  { %15 = vst [vmem:[#allocation3] sm:$0x1] %v14_v0 }
   0x3   :  { %16 = vsyncpa [#allocation5], 0 }
   0x4   :  { %17 = vsyncpa [#allocation8], 0 }
   0x5   :  { %18 = vsyncpa [#allocation6], 0 }
   0x6   :  { %20 = vsyncpa [#allocation6 + $0x1], 0  ;;  %s1781_s11 = smov 0   ;;  %s1783_s12 = smov 0  }
   0x7   :  { %s1785_s13 = smov 0   ;;  %s1787_s14 = smov 0  }
   0x8 LB: > { %2069 = sst [smem:[#allocation13_spill]] %s1714_s13  ;;  %s1802_s6 = sadd.s32 4294967295, %s1718_s14   ;;  %s1718_s14 = sphi %s1787_s14, %s2086_s14   ;;  %s1714_s13 = sphi %s1785_s13, %s2083_s13   ;;  %s1710_s12 = sphi %s1783_s12, %s2085_s12   ;;  %s1706_s11 = sphi %s1781_s11, %s2084_s11  }
   0x9   : > { %s1223_s15 = sadd.s32 4294967294, %s1718_s14   ;;  %s1806_s16 = sadd.s32 1, %s1718_s14  }
   0xa   : > { %s227_s17 = sadd.s32 1, %s1714_s13  ;;  %s224_s18 = ssub.s32 %s1718_s14, %s1806_s16 }
   0xb   : > { %p237_p0 = scmp.ne.s32.totalorder %s1714_s13, %s1710_s12  ;;  %p225_p1 = scmp.eq.s32.totalorder %s224_s18, 0 }
   0xc   : > { %p238_p2 = scmp.eq.s32.totalorder %s1802_s6, 1  ;;  %p243_p3 = scmp.ne.s32.totalorder %s1710_s12, %s1706_s11 }
   0xd   : > { %p244_p4 = scmp.eq.s32.totalorder %s1223_s15, 1  ;;  %p1224_p7 = scmp.ge.s32.totalorder %s1718_s14, 1 }
   0xe   : > { %s1817_s19 = scalar_select %p225_p1, %s1714_s13, %s227_s17  }
   0xf   : > { %p1819_p5 = por %p238_p2, %p237_p0  ;;  %p1823_p6 = por %p244_p4, %p243_p3 }
  0x10   : > { %2070 = sst [smem:[#allocation14_spill]] %s1817_s19  ;;  %p251_p8 = scmp.lt.s32.totalorder %s1718_s14, 3 }
  0x11   : > { %s2071_s20 = scalar_select %p1819_p5, 1, 0 }
  0x12   : > { %s2072_s21 = scalar_select %p1823_p6, 1, 0 }
  0x13   : > { %p2065_p9 = scmp.eq.s32.totalorder %s1802_s6, 0  ;;  %p1830_p10 = pnand %p1224_p7, %p251_p8 }
  0x14   : > { %s1720_s23 = smov [#allocation4]   ;;  %s1721_s26 = smov [#allocation7]  }
  0x15   : > { %s2073_s22 = scalar_select %p1830_p10, 1, 0 }
  0x16   : > { %s263_s24 = sshll.u32 %s1720_s23, 4  ;;  %p1485_p11 = pneg %p1830_p10  ;;  %s264_s24 = int_to_ptr.vmem [resolvable:$true] %s263_s24 }
  0x17   : > { %s279_s27 = sshll.u32 %s1721_s26, 4  ;;  %s1592_s30 = scalar_lea.hbm %s2056_s1, 3072  ;;  %s1842_s27 = int_to_ptr.vmem [resolvable:$true] %s279_s27 }
  0x18   : > { %p1838_p12 = pnand %p2065_p9, %p1485_p11  ;;  %p1593_p13 = scmp.ne.s32.totalorder %s2056_s1, %s1592_s30 }
  0x19   : > { %p1599_p3 = scmp.lt.u32.totalorder %s1592_s30, %s2056_s1 }
  0x1a   : > { %p1594_p0 = pneg %p1838_p12 }
  0x1c   : > { %p1595_p1 = pnand %p1594_p0, %p1593_p13 }
  0x1e   : > { %p1596_p2 = pneg %p1595_p1 }
  0x20   : > { %p1601_p4 = pnand %p1599_p3, %p1596_p2 }
  0x22   : > { %1604 = shalt.err (!%p1601_p4)
}
  0x23   : > { %s1605_s23 = scalar_lea.vmem %s264_s24, 3072  ;;  %p1613_p9 = scmp.lt.s32.totalorder %s264_s24, %s264_s24 }
  0x24   : > { %p1606_p7 = scmp.ne.s32.totalorder %s264_s24, %s1605_s23  ;;  %p1614_p6 = scmp.lt.s32.totalorder %s1605_s23, %s1605_s23 }
  0x26   : > { %p1608_p8 = pnand %p1606_p7, %p1594_p0  ;;  %p1615_p5 = por %p1614_p6, %p1613_p9 }
  0x28   : > { %p1609_p11 = pneg %p1608_p8 }
  0x2a   : > { %p1616_p10 = pnand %p1615_p5, %p1609_p11 }
  0x2c   : > { %1619 = shalt.err (!%p1616_p10)
}
  0x2d   : > { %s1722_s26 = smov 64   ;;  %s1723_s28 = smov 4  }
  0x2e   : > { %1488 = dma.hbm_to_vmem [thread:$0]  (!%p1838_p12), %s2056_s1, 3072, %s264_s24, [#allocation5], %s1722_s26, %s1722_s26, %s1723_s28  }
  0x2f   : > { %s1620_s17 = scalar_lea.hbm %s2058_s3, 3072 }
  0x30   : > { %p1621_p13 = scmp.ne.s32.totalorder %s2058_s3, %s1620_s17  ;;  %p1627_p9 = scmp.lt.u32.totalorder %s1620_s17, %s2058_s3 }
  0x32   : > { %p1623_p5 = pnand %p1621_p13, %p1594_p0 }
  0x34   : > { %p1624_p6 = pneg %p1623_p5 }
  0x36   : > { %p1629_p10 = pnand %p1627_p9, %p1624_p6 }
  0x38   : > { %1632 = shalt.err (!%p1629_p10)
}
  0x39   : > { %s1633_s24 = scalar_lea.vmem %s1842_s27, 3072  ;;  %p1641_p4 = scmp.lt.s32.totalorder %s1842_s27, %s1842_s27 }
  0x3a   : > { %p1634_p1 = scmp.ne.s32.totalorder %s1842_s27, %s1633_s24  ;;  %p1642_p7 = scmp.lt.s32.totalorder %s1633_s24, %s1633_s24 }
  0x3c   : > { %p1636_p2 = pnand %p1634_p1, %p1594_p0  ;;  %p1643_p8 = por %p1642_p7, %p1641_p4 }
  0x3e   : > { %p1637_p3 = pneg %p1636_p2 }
  0x40   : > { %p1644_p11 = pnand %p1643_p8, %p1637_p3 }
  0x42   : > { %1647 = shalt.err (!%p1644_p11)
}
  0x43   : > { %1491 = dma.hbm_to_vmem [thread:$0]  (!%p1838_p12), %s2058_s3, 3072, %s1842_s27, [#allocation8], %s1722_s26, %s1722_s26, %s1723_s28  }
  0x44   : > { %p2075_p13 = scmp.ne.s32.totalorder %s2073_s22, 0 }
  0x45   : > { %p2076_p5 = scmp.eq.s32.totalorder (!%p2075_p13), %s1802_s6, 0 }
  0x46   : > { %317 = sbr.rel (%p2075_p13) target bundleno = 1059 (0x423), region = 56 }
  0x4d   : > { %1693 = dma.done.wait (%p2076_p5), [#allocation5], 3072   ;;  %p2077_p0 = pmov %p2076_p5 }
  0x4f   : > { %1695 = vsyncadd (%p2077_p0), [#allocation5], 4294964224  ;;  %p2078_p6 = pmov %p2077_p0 }
  0x50   : > { %p2079_p9 = pmov %p2077_p0 }
  0x51   : > { %1697 = dma.done.wait (%p2078_p6), [#allocation8], 3072  }
  0x52   : > { %1699 = vsyncadd (%p2079_p9), [#allocation8], 4294964224  ;;  %v1724_v1 = vmov 0.0   ;;  %vm1725_vm0 = vmmov 0   ;;  %v1540_v2 = vld [vmem:[#allocation4 + $0x40] sm:$0xff]   ;;  %v1543_v5 = vld [vmem:[#allocation4 + $0x48] sm:$0xff]  }
  0x53   : > { %1371 = vmatprep.subr.bf16.mxu1 %v1724_v1  ;;  %361 = vst [vmem:[#allocation2] sm:$0x1] %v1724_v1  ;;  %362 = vst [vmem:[#allocation2 + $0x9] sm:$0x1] %v1724_v1  ;;  %1387 = vmatprep.mubr.msk.bf16.mxu1 %vm1725_vm0, %v1724_v1  ;;  %v1541_v3 = vld [vmem:[#allocation4] sm:$0xff]   ;;  %v1544_v6 = vld [vmem:[#allocation4 + $0x8] sm:$0xff]  }
  0x54   : > { %1290 = vmatprep.subr.bf16.mxu0 %v1540_v2  ;;  %v1542_v4 = vld [vmem:[#allocation4 + $0x80] sm:$0xff]   ;;  %v1545_v7 = vld [vmem:[#allocation4 + $0x88] sm:$0xff]   ;;  %v1546_v8 = vld [vmem:[#allocation4 + $0x50] sm:$0xff]   ;;  %p356_p12 = scmp.lt.s32.totalorder %s1802_s6, 1  ;;  %v1726_v56 = vmov 0.0|0.0   ;;  %vm1040_vm1 = vcmask 1040384  }
  0x55   : > { %1291 = vmatpush3.bf16.msra.mxu0 %v1541_v3  ;;  %1372 = vmatpush3.bf16.msra.mxu1 %v1542_v4  ;;  %v1547_v9 = vld [vmem:[#allocation4 + $0x10] sm:$0xff]   ;;  %v1549_v11 = vld [vmem:[#allocation4 + $0x58] sm:$0xff]   ;;  %v1552_v14 = vld [vmem:[#allocation4 + $0x60] sm:$0xff]   ;;  %vm1036_vm2 = vcmask 7168   ;;  %s1287_s27 = sshll.u32 %s1802_s6, 7  ;;  %p2080_p1 = scmp.ne.s32.totalorder %s2071_s20, 0 }
  0x56   : > { %1292 = vmatprep.subr.bf16.mxu0 %v1543_v5  ;;  %1373 = vmatprep.subr.bf16.mxu1 %v1724_v1  ;;  %v1548_v10 = vld [vmem:[#allocation4 + $0x90] sm:$0xff]   ;;  %v1550_v12 = vld [vmem:[#allocation4 + $0x18] sm:$0xff]   ;;  %s357_s22 = scalar_select %p356_p12, %s1802_s6, 1  ;;  %v1553_v15 = vld [vmem:[#allocation4 + $0x20] sm:$0xff]  }
  0x57   : > { %v1551_v13 = vld [vmem:[#allocation4 + $0x98] sm:$0xff]   ;;  %v1554_v16 = vld [vmem:[#allocation4 + $0xa0] sm:$0xff]   ;;  %v1555_v17 = vld [vmem:[#allocation4 + $0x68] sm:$0xff]   ;;  %s2013_s10 = scalar_lea.hbm %s2064_s9, %s1287_s27  ;;  %s1727_s6 = smov [#allocation9]  }
  0x58   : > { %s1232_s25 = sshll.u32 %s357_s22, 3  ;;  %v1556_v18 = vld [vmem:[#allocation4 + $0x28] sm:$0xff]   ;;  %v1558_v20 = vld [vmem:[#allocation4 + $0x70] sm:$0xff]   ;;  %v1561_v24 = vld [vmem:[#allocation4 + $0x78] sm:$0xff]   ;;  %s353_s22 = sand.u32 1, %s1710_s12  }
  0x59   : > { %1293 = vmatpush3.bf16.msra.mxu0 %v1544_v6  ;;  %1374 = vmatpush3.bf16.msra.mxu1 %v1545_v7  ;;  %v1557_v19 = vld [vmem:[#allocation4 + $0xa8] sm:$0xff]   ;;  %s359_s28 = scalar_lea.vmem %s2055_s0, %s1232_s25  ;;  %v1559_v21 = vld [vmem:[#allocation4 + $0x30] sm:$0xff]   ;;  %v1562_v26 = vld [vmem:[#allocation4 + $0x38] sm:$0xff]   ;;  %s1231_s25 = sshll.u32 %s353_s22, 3 }
  0x5a   : > { %1294 = vmatprep.subr.bf16.mxu0 %v1546_v8  ;;  %1375 = vmatprep.subr.bf16.mxu1 %v1724_v1  ;;  %v1560_v22 = vld [vmem:[#allocation4 + $0xb0] sm:$0xff]   ;;  %v1563_v27 = vld [vmem:[#allocation4 + $0xb8] sm:$0xff]   ;;  %v1564_v28 = vld [vmem:[#allocation7 + $0x40] sm:$0xff]   ;;  %s355_s26 = scalar_lea.vmem [#allocation9], %s1231_s25  ;;  %s1129_s15 = scalar_lea.sflag [#allocation6], %s353_s22 }
  0x5b   : > { %v1916_v23 = vld [vmem:[%s359_s28] sm:$0xff]  ;;  %v1565_v29 = vld [vmem:[#allocation7 + $0x80] sm:$0xff]   ;;  %v1573_v41 = vld [vmem:[#allocation7 + $0x58] sm:$0xff]   ;;  %s1142_s28 = sshll.u32 %s355_s26, 4  ;;  %s1652_s18 = sshll.u32 %s1727_s6, 4  ;;  %s2015_s28 = int_to_ptr.vmem [resolvable:$true] %s1142_s28  ;;  %s1653_s18 = int_to_ptr.vmem [resolvable:$false] %s1652_s18 }
  0x5c   : > { %364 = vst [vmem:[#allocation2 + $0x1] sm:$0xff] %v1916_v23  ;;  %v369_v25 = vpack.c.bf16 %v1916_v23, %v1916_v23  ;;  %v1566_v32 = vld [vmem:[#allocation7] sm:$0xff]   ;;  %v1567_v35 = vld [vmem:[#allocation7 + $0x48] sm:$0xff]   ;;  %v1570_v38 = vld [vmem:[#allocation7 + $0x50] sm:$0xff]   ;;  %s1648_s17 = scalar_lea.vmem %s2015_s28, 128  ;;  %s1654_s23 = scalar_lea.vmem %s1653_s18, 256 }
  0x5d   : > { %1295 = vmatpush3.bf16.msra.mxu0 %v1547_v9  ;;  %1376 = vmatpush3.bf16.msra.mxu1 %v1548_v10  ;;  %v1569_v36 = vld [vmem:[#allocation7 + $0x8] sm:$0xff]   ;;  %v1572_v39 = vld [vmem:[#allocation7 + $0x10] sm:$0xff]   ;;  %v1574_v42 = vld [vmem:[#allocation7 + $0x98] sm:$0xff]   ;;  %p1649_p10 = scmp.ne.s32.totalorder %s2015_s28, %s1648_s17  ;;  %p1655_p4 = scmp.lt.s32.totalorder %s2015_s28, %s1653_s18 }
  0x5e   : > { %1296 = vmatprep.subr.bf16.mxu0 %v1549_v11  ;;  %1377 = vmatprep.subr.bf16.mxu1 %v1724_v1  ;;  %v1568_v37 = vld [vmem:[#allocation7 + $0x88] sm:$0xff]   ;;  %v1571_v40 = vld [vmem:[#allocation7 + $0x90] sm:$0xff]   ;;  %v1575_v43 = vld [vmem:[#allocation7 + $0x18] sm:$0xff]   ;;  %p1656_p7 = scmp.lt.s32.totalorder %s1654_s23, %s1648_s17 }
  0x5f   : > { %602 = vmatprep.mubr.bf16.mxu0 %v369_v25  ;;  %v1576_v44 = vld [vmem:[#allocation7 + $0x60] sm:$0xff]   ;;  %v1579_v47 = vld [vmem:[#allocation7 + $0x68] sm:$0xff]   ;;  %v1582_v50 = vld [vmem:[#allocation7 + $0x70] sm:$0xff]   ;;  %p1650_p2 = pnand %p1649_p10, %p2080_p1 }
  0x60   : > { %v1577_v45 = vld [vmem:[#allocation7 + $0xa0] sm:$0xff]   ;;  %v1580_v48 = vld [vmem:[#allocation7 + $0xa8] sm:$0xff]   ;;  %v1583_v51 = vld [vmem:[#allocation7 + $0xb0] sm:$0xff]   ;;  %p1657_p8 = por %p1656_p7, %p1655_p4 }
  0x61   : > { %1297 = vmatpush3.bf16.msra.mxu0 %v1550_v12  ;;  %1378 = vmatpush3.bf16.msra.mxu1 %v1551_v13  ;;  %v1578_v46 = vld [vmem:[#allocation7 + $0x20] sm:$0xff]   ;;  %v1581_v49 = vld [vmem:[#allocation7 + $0x28] sm:$0xff]   ;;  %v1584_v52 = vld [vmem:[#allocation7 + $0x30] sm:$0xff]   ;;  %p1651_p3 = pneg %p1650_p2 }
  0x62   : > { %1298 = vmatprep.subr.bf16.mxu0 %v1552_v14  ;;  %1379 = vmatprep.subr.bf16.mxu1 %v1724_v1  ;;  %v1585_v53 = vld [vmem:[#allocation7 + $0x78] sm:$0xff]   ;;  %v1233_v59 = vld [vmem:[%s2057_s2] ss:$0 sm:$0xff] }
  0x63   : > { %v365_v30 = vld [vmem:[#allocation2] sm:$0xff]  ;;  %v1586_v54 = vld [vmem:[#allocation7 + $0xb8] sm:$0xff]   ;;  %p1658_p11 = pnand %p1657_p8, %p1651_p3 }
  0x64   : > { %v367_v31 = vld [vmem:[#allocation2 + $0x2] sm:$0xff]  ;;  %v368_v33 = vpack.c.bf16 %v365_v30, %v365_v30 }
  0x65   : > { %1299 = vmatpush3.bf16.msra.mxu0 %v1553_v15  ;;  %1380 = vmatpush3.bf16.msra.mxu1 %v1554_v16  ;;  %v370_v34 = vpack.c.bf16 %v367_v31, %v367_v31  ;;  %v1587_v55 = vld [vmem:[#allocation7 + $0x38] sm:$0xff]   ;;  %v946_v8 = vld [vmem:[%s2060_s5] sm:$0xff]  ;;  %v949_v16 = vld [vmem:[%s2060_s5 + $0x18] sm:$0xff] }
  0x66   : > { %1300 = vmatprep.subr.bf16.mxu0 %v1555_v17  ;;  %1381 = vmatprep.subr.bf16.mxu1 %v1724_v1  ;;  %v947_v9 = vld [vmem:[%s2060_s5 + $0x8] sm:$0xff]  ;;  %v948_v15 = vld [vmem:[%s2060_s5 + $0x10] sm:$0xff]  ;;  %v958_v30 = vld [vmem:[%s2060_s5 + $0x60] sm:$0xff] }
  0x67   : > { %v1452_v12 = vpack.c.bf16 %v947_v9, %v946_v8  ;;  %v1455_v17 = vpack.c.bf16 %v949_v16, %v948_v15  ;;  %v955_v25 = vld [vmem:[%s2060_s5 + $0x48] sm:$0xff] }
  0x68   : > { %v959_v31 = vld [vmem:[%s2060_s5 + $0x68] sm:$0xff] }
  0x69   : > { %1301 = vmatpush3.bf16.msra.mxu0 %v1556_v18  ;;  %1382 = vmatpush3.bf16.msra.mxu1 %v1557_v19  ;;  %v950_v18 = vld [vmem:[%s2060_s5 + $0x20] sm:$0xff]  ;;  %v951_v19 = vld [vmem:[%s2060_s5 + $0x28] sm:$0xff] }
  0x6a   : > { %1302 = vmatprep.subr.bf16.mxu0 %v1558_v20  ;;  %1383 = vmatprep.subr.bf16.mxu1 %v1724_v1  ;;  %v1458_v20 = vpack.c.bf16 %v951_v19, %v950_v18 }
  0x6d   : > { %1303 = vmatpush3.bf16.msra.mxu0 %v1559_v21  ;;  %1384 = vmatpush3.bf16.msra.mxu1 %v1560_v22  ;;  %v952_v21 = vld [vmem:[%s2060_s5 + $0x30] sm:$0xff] }
  0x6e   : > { %1304 = vmatprep.subr.bf16.mxu0 %v1561_v24  ;;  %1385 = vmatprep.subr.bf16.mxu1 %v1724_v1  ;;  %v954_v24 = vld [vmem:[%s2060_s5 + $0x40] sm:$0xff] }
  0x71   : > { %1305 = vmatpush3.bf16.msra.mxu0 %v1562_v26  ;;  %1386 = vmatpush3.bf16.msra.mxu1 %v1563_v27  ;;  %v1464_v26 = vpack.c.bf16 %v955_v25, %v954_v24  ;;  %v956_v27 = vld [vmem:[%s2060_s5 + $0x50] sm:$0xff] }
  0x72   : > { %1321 = vmatprep.subr.bf16.mxu0 %v1564_v28  ;;  %1391 = vmatprep.subr.bf16.mxu1 %v1724_v1  ;;  %v957_v28 = vld [vmem:[%s2060_s5 + $0x58] sm:$0xff] }
  0x74   : > { %603 = vmatmul.mubr.bf16.vlgmr.msra.gmra.mrb[0].mxu0 %v368_v33  ;;  %1388 = vmatmul.mubr.bf16.vlgmr.msra.gmra.mrb[0].mxu1 %v370_v34  ;;  %v960_v33 = vld [vmem:[%s2060_s5 + $0x70] sm:$0xff]  ;;  %v961_v34 = vld [vmem:[%s2060_s5 + $0x78] sm:$0xff] }
  0x75   : > { %1322 = vmatpush3.bf16.msra.mxu0 %v1566_v32  ;;  %1392 = vmatpush3.bf16.msra.mxu1 %v1565_v29  ;;  %v1467_v29 = vpack.c.bf16 %v957_v28, %v956_v27  ;;  %v1470_v32 = vpack.c.bf16 %v959_v31, %v958_v30 }
  0x76   : > { %1323 = vmatprep.subr.bf16.mxu0 %v1567_v35  ;;  %1393 = vmatprep.subr.bf16.mxu1 %v1724_v1  ;;  %v1473_v35 = vpack.c.bf16 %v961_v34, %v960_v33 }
  0x77   : > { %1407 = vmatprep.mubr.msk.bf16.mxu1 %vm1725_vm0, %v1724_v1 }
  0x79   : > { %1324 = vmatpush3.bf16.msra.mxu0 %v1569_v36  ;;  %1394 = vmatpush3.bf16.msra.mxu1 %v1568_v37  ;;  %v1034_v36 = vld [vmem:[%s2062_s7] sm:$0x1] }
  0x7a   : > { %1325 = vmatprep.subr.bf16.mxu0 %v1570_v38  ;;  %1395 = vmatprep.subr.bf16.mxu1 %v1724_v1 }
  0x7d   : > { %1326 = vmatpush3.bf16.msra.mxu0 %v1572_v39  ;;  %1396 = vmatpush3.bf16.msra.mxu1 %v1571_v40  ;;  %v1258_v40 = vld [vmem:[%s2059_s4] ss:$0 sm:$0xff] }
  0x7e   : > { %1397 = vmatprep.subr.bf16.mxu1 %v1724_v1  ;;  %1327 = vmatprep.subr.bf16.mxu0 %v1573_v41 }
  0x81   : > { %1398 = vmatpush3.bf16.msra.mxu1 %v1574_v42  ;;  %1328 = vmatpush3.bf16.msra.mxu0 %v1575_v43 }
  0x82   : > { %1399 = vmatprep.subr.bf16.mxu1 %v1724_v1  ;;  %1329 = vmatprep.subr.bf16.mxu0 %v1576_v44 }
  0x85   : > { %1400 = vmatpush3.bf16.msra.mxu1 %v1577_v45  ;;  %1330 = vmatpush3.bf16.msra.mxu0 %v1578_v46 }
  0x86   : > { %1401 = vmatprep.subr.bf16.mxu1 %v1724_v1  ;;  %1331 = vmatprep.subr.bf16.mxu0 %v1579_v47 }
  0x89   : > { %1402 = vmatpush3.bf16.msra.mxu1 %v1580_v48  ;;  %1332 = vmatpush3.bf16.msra.mxu0 %v1581_v49 }
  0x8a   : > { %1403 = vmatprep.subr.bf16.mxu1 %v1724_v1  ;;  %1333 = vmatprep.subr.bf16.mxu0 %v1582_v50 }
  0x8d   : > { %1404 = vmatpush3.bf16.msra.mxu1 %v1583_v51  ;;  %1334 = vmatpush3.bf16.msra.mxu0 %v1584_v52 }
  0x8e   : > { %1405 = vmatprep.subr.bf16.mxu1 %v1724_v1  ;;  %1335 = vmatprep.subr.bf16.mxu0 %v1585_v53 }
  0x91   : > { %1406 = vmatpush3.bf16.msra.mxu1 %v1586_v54  ;;  %1336 = vmatpush3.bf16.msra.mxu0 %v1587_v55 }
  0x92   : > { %1446 = vmatprep.subr.mxu1 %v1724_v1  ;;  %1451 = vmatprep.subr.bf16.mxu0 %v1726_v56 }
 0x147   : > { %v1306_v57 = vpop.f32.mrb[0].mxu0  ;;  %v644_v60 = vpop.f32.mrb[0].mxu1 }
 0x148   : > { %v1307_v58 = vpop.f32.mrb[1].mxu0  ;;  %v1389_v63 = vpop.f32.mrb[1].mxu1 }
 0x149   : > { %v1308_v61 = vadd.f32 %v1307_v58, %v1306_v57  ;;  %v1309_v62 = vpop.f32.mrb[2].mxu0  ;;  %v647_v2 = vpop.f32.mrb[2].mxu1 }
 0x14a   : > { %v1310_v0 = vpop.f32.mrb[3].mxu0  ;;  %v1390_v4 = vpop.f32.mrb[3].mxu1 }
 0x14b   : > { %v605_v3 = vadd.f32 %v1308_v61, %v1233_v59  ;;  %v1035_v61 = vld [vmem:[%s2063_s8] sm:$0x1] }
 0x14d   : > { %v645_v5 = vadd.f32 %v644_v60, %v605_v3 }
 0x14f   : > { %v650_v6 = vmax.f32 %v645_v5, 0.0  ;;  %v1121_v5 = vlaneseq }
 0x151   : > { %651 = vst [vmem:[#allocation2 + $0x1] sm:$0xff] %v650_v6  ;;  %v656_v7 = vpack.c.bf16 %v650_v6, %v650_v6  ;;  %v1122_v6 = vshrl.u32 %v1121_v5, 7 }
 0x153   : > { %889 = vmatprep.mubr.bf16.mxu0 %v656_v7  ;;  %v1123_v7 = vsub.s32 0, %v1122_v6 }
 0x158   : > { %v654_v10 = vld [vmem:[#allocation2 + $0x2] sm:$0xff] }
 0x159   : > { %v652_v11 = vld [vmem:[#allocation2] sm:$0xff]  ;;  %v657_v13 = vpack.c.bf16 %v654_v10, %v654_v10 }
 0x15a   : > { %v655_v14 = vpack.c.bf16 %v652_v11, %v652_v11 }
 0x15b   : > { %1408 = vmatmul.mubr.bf16.vlgmr.msra.gmra.mrb[4].mxu1 %v657_v13 }
 0x15c   : > { %890 = vmatmul.mubr.bf16.vlgmr.msra.gmra.mrb[4].mxu0 %v655_v14  ;;  %1448 = vmatprep.mubr.msk.f32.mxu1 %vm1725_vm0, %v1724_v1 }
 0x15d   : > { %1453 = vmatpush3.bf16.msra.mxu0 %v1452_v12  ;;  %1443 = vmatprep.mubr.msk.f32.mxu0 %vm1725_vm0, %v1724_v1  ;;  %v953_v1 = vld [vmem:[%s2060_s5 + $0x38] sm:$0xff] }
 0x15e   : > { %1454 = vmatprep.subr.bf16.mxu0 %v1726_v56  ;;  %v1461_v22 = vpack.c.bf16 %v953_v1, %v952_v21  ;;  %1447 = vmatpush3.msk.msra.mxu1 %vm1040_vm1, %v1034_v36 }
 0x161   : > { %1456 = vmatpush3.bf16.msra.mxu0 %v1455_v17 }
 0x162   : > { %1457 = vmatprep.subr.bf16.mxu0 %v1726_v56 }
 0x165   : > { %1459 = vmatpush3.bf16.msra.mxu0 %v1458_v20 }
 0x166   : > { %1460 = vmatprep.subr.bf16.mxu0 %v1726_v56 }
 0x169   : > { %1462 = vmatpush3.bf16.msra.mxu0 %v1461_v22 }
 0x16a   : > { %1463 = vmatprep.subr.bf16.mxu0 %v1726_v56 }
 0x16d   : > { %1465 = vmatpush3.bf16.msra.mxu0 %v1464_v26 }
 0x16e   : > { %1466 = vmatprep.subr.bf16.mxu0 %v1726_v56 }
 0x171   : > { %1468 = vmatpush3.bf16.msra.mxu0 %v1467_v29 }
 0x172   : > { %1469 = vmatprep.subr.bf16.mxu0 %v1726_v56 }
 0x175   : > { %1471 = vmatpush3.bf16.msra.mxu0 %v1470_v32 }
 0x176   : > { %1472 = vmatprep.subr.bf16.mxu0 %v1726_v56  ;;  %v962_v56 = vld [vmem:[#allocation3] sm:$0x1] }
 0x179   : > { %1474 = vmatpush3.bf16.msra.mxu0 %v1473_v35 }
 0x22e   : > { %v931_v37 = vpop.f32.mrb[4].mxu1 }
 0x22f   : > { %v1337_v38 = vpop.f32.mrb[4].mxu0  ;;  %v1409_v39 = vpop.f32.mrb[5].mxu1 }
 0x230   : > { %v1338_v41 = vpop.f32.mrb[5].mxu0  ;;  %v934_v43 = vpop.f32.mrb[6].mxu1 }
 0x231   : > { %v1339_v42 = vadd.f32 %v1338_v41, %v1337_v38  ;;  %v1340_v44 = vpop.f32.mrb[6].mxu0  ;;  %v1410_v45 = vpop.f32.mrb[7].mxu1 }
 0x232   : > { %v1341_v46 = vpop.f32.mrb[7].mxu0 }
 0x233   : > { %v892_v47 = vadd.f32 %v1339_v42, %v1258_v40 }
 0x235   : > { %v932_v48 = vadd.f32 %v931_v37, %v892_v47 }
 0x237   : > { %v939_v49 = vmul.f32 %v932_v48, %v1916_v23  ;;  %v938_v10 = vadd.f32 %v932_v48, %v1916_v23 }
 0x239   : > { %v940_v50 = vrot.slane %v939_v49, 4 }
 0x23b   : > { %v941_v51 = vadd.f32 %v940_v50, %v939_v49 }
 0x23d   : > { %v942_v52 = vrot.slane %v941_v51, 2 }
 0x23f   : > { %v943_v53 = vadd.f32 %v942_v52, %v941_v51 }
 0x241   : > { %v944_v54 = vrot.slane %v943_v53, 1 }
 0x243   : > { %v945_v55 = vadd.f32 %v944_v54, %v943_v53 }
 0x245   : > { %1444 = vmatmul.mubr.f32.vlgmr.msra.gmra.mrb[8].mxu0 %v945_v55 }
 0x318   : > { %v1029_v57 = vpop.f32.mrb[8].mxu0 }
 0x319   : > { %v1030_v58 = vadd.f32 %v1029_v57, %v962_v56  ;;  %v1445_v59 = vpop.f32.mrb[9].mxu0 }
 0x31b   : > { %v1033_v60 = vmax.f32 %v1030_v58, 0.0 }
 0x31d   : > { %1449 = vmatmul.mubr.msk.f32.vlgmr.msra.gmra.mrb[8].mxu1 %vm1036_vm2, %v1033_v60 }
 0x3f0   : > { %v1110_v62 = vpop.f32.mrb[8].mxu1 }
 0x3f1   : > { %v1111_v63 = vadd.f32 %v1110_v62, %v1035_v61  ;;  %v1450_v0 = vpop.f32.mrb[9].mxu1 }
 0x3f3   : > { %v1285_v2 = vmul.f32 -1.442695, %v1111_v63 }
 0x3f5   : > { %1588 = vpow2.f32 %v1285_v2 }
 0x3ff   : > { %v1589_v3 = vpop.eup %1588 }
 0x400   : > { %v1117_v4 = vadd.f32 1.0, %v1589_v3 }
 0x402   : > { %1590 = vrcp.f32 %v1117_v4 }
 0x40c   : > { %v1591_v8 = vpop.eup %1590 }
 0x40d   : > { %v1120_v9 = vadd.f32 0.5, %v1591_v8 }
 0x40f   : > { %v1124_v11 = vrot.slane %v1120_v9, %v1123_v7 }
 0x411   : > { %v1125_v12 = vmul.f32 %v1124_v11, %v938_v10 }
 0x413   : > { %v1126_v13 = vmax.f32 %v1125_v12, 0.0 }
 0x415   : > { %1127 = vst [vmem:[%s355_s26] sm:$0xff] %v1126_v13 }
 0x416   : > { %1661 = shalt.err (!%p1658_p11)
}
 0x417   : > { %s1662_s24 = scalar_lea.hbm %s2013_s10, 128  ;;  %s1666_s22 = scalar_lea.hbm %s2064_s9, 256 }
 0x418   : > { %p1663_p13 = scmp.ne.s32.totalorder %s2013_s10, %s1662_s24  ;;  %p1667_p6 = scmp.lt.u32.totalorder %s2013_s10, %s2064_s9 }
 0x419   : > { %p1668_p9 = scmp.lt.u32.totalorder %s1666_s22, %s1662_s24  ;;  %p1670_p10 = scmp.lt.u32.totalorder %s1662_s24, %s2013_s10 }
 0x41a   : > { %p1664_p5 = pnand %p1663_p13, %p2080_p1 }
 0x41b   : > { %p1669_p12 = por %p1668_p9, %p1667_p6 }
 0x41c   : > { %p1665_p0 = pneg %p1664_p5 }
 0x41d   : > { %p1671_p2 = por %p1670_p10, %p1669_p12 }
 0x41f   : > { %p1672_p3 = pnand %p1671_p2, %p1665_p0 }
 0x421   : > { %1675 = shalt.err (!%p1672_p3)
}
 0x422   : > { %1483 = dma.vmem_to_hbm [thread:$0]  (%p2080_p1), %s2015_s28, 128, %s2013_s10, %s1129_s15  }
 0x423 PF: > { %p1500_p4 = scmp.ge.s32.totalorder %s1718_s14, 2  ;;  %s1154_s26 = sand.u32 1, %s1706_s11  }
 0x424   : > { %p2081_p7 = scmp.ne.s32.totalorder %s2072_s21, 0  ;;  %s1155_s29 = scalar_lea.sflag [#allocation6], %s1154_s26 }
 0x426   : > { %p1493_p8 = pnand %p1500_p4, %p2081_p7 }
 0x428   : > { %1701 = dma.done.wait (!%p1493_p8), %s1155_s29, 128  }
 0x429   : > { %1703 = vsyncadd (!%p1493_p8), %s1155_s29, 4294967168  ;;  %s2082_s30 = sld [smem:[#allocation13_spill]]  ;;  %s2083_s13 = sld [smem:[#allocation14_spill]] }
 0x42a   : > { %p23_p11 = scmp.ge.s32.totalorder %s1806_s16, 4   ;;  %s2084_s11 = smov %s1710_s12 }
 0x42b   : > { %s2086_s14 = smov %s1806_s16 }
 0x42c   :  { %25 = sbr.rel (!%p23_p11) target bundleno = 8 (0x8), region = 100 }
 0x42f   : > { %s2085_s12 = smov %s2082_s30 }
 0x433   :  { %1160 = vsyncpa [#allocation5], 1 }
 0x434   :  { %1162 = vsyncpa [#allocation5 + $0x1], 1 }
 0x435   :  { %1163 = vsyncpa [#allocation8], 1 }
 0x436   :  { %1164 = vsyncpa [#allocation6], 1 }
 0x437   :  { %1166 = vsyncpa [#allocation6 + $0x1], 1 }

</bundles_post_ra>
